<compile_context>
chip_gen: v7x
topology: tpu7x:2x2x1
jax: 0.10.0
libtpu: 0.0.40
codegen_flags: <defaults>
</compile_context>

<pallas_src>
import functools

import jax
import jax.numpy as jnp
from jax.experimental import pallas as pl
from jax.experimental.pallas import tpu as pltpu


# ----------------------------------------------------------------------------
# Pallas kernel 1: 1x1 conv over channels, NCHW-native, full (8,128) tiles
# ----------------------------------------------------------------------------
_CONV_LANES = 128
_CONV_S_TILE = 128      # sublane rows of spatial per grid step (16K elem/chan)


def _conv1x1_kernel(x_ref, w_ref, b_ref, o_ref):
    """Per (batch, spatial-tile) block.

    x_ref: (Cin, S_TILE, 128)  VMEM  -- each channel is a dense (8,128) slab
    w_ref: (Cin, Cout)         SMEM  -- scalar reads
    b_ref: (Cout,)             SMEM
    o_ref: (Cout, S_TILE, 128) VMEM  -- full-tile unmasked stores
    """
    cin = x_ref.shape[0]
    cout = o_ref.shape[0]
    tile_shape = x_ref.shape[1:]
    # TODO(synk): once Cin/Cout reach ~64+, switch this scalar-broadcast VPU
    # MAC to an MXU jnp.dot of (hw_tile, Cin) x (Cin, Cout) with
    # preferred_element_type=f32, and use lax.fori_loop(unroll=True).
    for co in range(cout):                          # static unroll, Cout tiny
        acc = jnp.full(tile_shape, b_ref[co], dtype=jnp.float32)
        for ci in range(cin):                       # Cin MACs on the VPU
            acc = acc + w_ref[ci, co] * x_ref[ci].astype(jnp.float32)
        o_ref[co] = acc.astype(o_ref.dtype)


def _conv1x1_nchw_impl(x_nchw, w, b):
    """x: (B, Cin, H, W) -> (B, Cout, H, W); w: (Cin, Cout), b: (Cout,)."""
    B, Cin, H, W = x_nchw.shape
    Cout = w.shape[1]
    HW = H * W
    HW_pad = pl.cdiv(HW, _CONV_LANES) * _CONV_LANES
    S = HW_pad // _CONV_LANES

    # Contiguous reshape only (no transpose / extra layout pass): channels on
    # the leading axis, spatial split into dense (S, 128) lane-major slabs.
    x3d = x_nchw.reshape(B, Cin, HW)
    if HW_pad != HW:
        x3d = jnp.pad(x3d, ((0, 0), (0, 0), (0, HW_pad - HW)))
    x4d = x3d.reshape(B, Cin, S, _CONV_LANES)

    s_tile = S if S <= _CONV_S_TILE else _CONV_S_TILE   # full dim or mult of 8
    grid = (B, pl.cdiv(S, s_tile))

    y4d = pl.pallas_call(
        _conv1x1_kernel,
        out_shape=jax.ShapeDtypeStruct((B, Cout, S, _CONV_LANES), x_nchw.dtype),
        grid=grid,
        in_specs=[
            # Batch dim squeezed out of the kernel view.
            pl.BlockSpec((None, Cin, s_tile, _CONV_LANES),
                         lambda bi, si: (bi, 0, si, 0)),
            pl.BlockSpec(memory_space=pltpu.MemorySpace.SMEM),   # w (tiny)
            pl.BlockSpec(memory_space=pltpu.MemorySpace.SMEM),   # b (tiny)
        ],
        out_specs=pl.BlockSpec((None, Cout, s_tile, _CONV_LANES),
                               lambda bi, si: (bi, 0, si, 0)),
        compiler_params=pltpu.CompilerParams(
            dimension_semantics=("parallel", "parallel")),
    )(x4d, w, b)

    y3d = y4d.reshape(B, Cout, HW_pad)[:, :, :HW]
    return y3d.reshape(B, Cout, H, W)


conv1x1_nchw = jax.jit(_conv1x1_nchw_impl)


# ----------------------------------------------------------------------------
# Pallas kernel 2: EMA parameter update  ema = ema + (1-d)*(new - ema)
# ----------------------------------------------------------------------------
_EMA_LANES = 512                       # wide lane-dense blocks -> big vld/vst
_EMA_BLOCK_ROWS = 512                  # 512 x 512 x 4B = 1 MiB / operand / block
_EMA_PAD = 8 * _EMA_LANES              # packed buffer padded to one (8,512) tile


def _ema_kernel(decay_ref, ema_ref, new_ref, out_ref):
    d = decay_ref[0]                               # f32 scalar from SMEM
    e = ema_ref[...]                               # f32 master copy
    m = new_ref[...]
    out_ref[...] = (e + (1.0 - d) * (m - e)).astype(out_ref.dtype)


def _pick_block_rows(rows):
    """Biggest block <= _EMA_BLOCK_ROWS that still yields >= 2 grid steps."""
    if rows <= 8:
        return rows
    half = -(-rows // 2)
    half = ((half + 7) // 8) * 8                   # keep (8,128) divisibility
    return min(_EMA_BLOCK_ROWS, half)


@functools.partial(jax.jit, donate_argnums=(0,))
def _ema_update_packed(packed_ema, new_leaves, decay):
    """One fused EMA sweep over the packed f32 master buffer.

    packed_ema: flat f32 buffer, size a multiple of _EMA_PAD (donated).
    new_leaves: list of student parameter arrays (any shapes / dtypes).
    decay:      traced scalar -> changing it does NOT recompile.
    """
    n = packed_ema.size
    flat_new = jnp.concatenate(
        [jnp.ravel(l).astype(jnp.float32) for l in new_leaves])
    flat_new = jnp.pad(flat_new, (0, n - flat_new.size))

    rows = n // _EMA_LANES                          # multiple of 8 by padding
    e2 = packed_ema.reshape(rows, _EMA_LANES)
    m2 = flat_new.reshape(rows, _EMA_LANES)
    block_rows = _pick_block_rows(rows)
    d = jnp.asarray(decay, jnp.float32).reshape((1,))

    out = pl.pallas_call(
        _ema_kernel,
        out_shape=jax.ShapeDtypeStruct((rows, _EMA_LANES), jnp.float32),
        grid=(pl.cdiv(rows, block_rows),),
        in_specs=[
            pl.BlockSpec(memory_space=pltpu.MemorySpace.SMEM),       # decay
            pl.BlockSpec((block_rows, _EMA_LANES), lambda i: (i, 0)),  # ema
            pl.BlockSpec((block_rows, _EMA_LANES), lambda i: (i, 0)),  # new
        ],
        out_specs=pl.BlockSpec((block_rows, _EMA_LANES), lambda i: (i, 0)),
        # EMA is in-place: aliased output + donated input -> no defensive copy.
        input_output_aliases={1: 0},
        compiler_params=pltpu.CompilerParams(
            dimension_semantics=("parallel",)),
    )(d, e2, m2)
    return out.reshape(n)


# ----------------------------------------------------------------------------
# Synthetic wrapped module (the "model" ModelEMA deep-copies)
# ----------------------------------------------------------------------------
class SyntheticModel:
    """Shared 1x1-conv encoder applied to source / target (and aug) inputs."""

    def __init__(self, params):
        self.params = params  # {"w": (Cin, Cout), "b": (Cout,)}

    def __call__(self, src_data, tar_data, aug_src_data=None, aug_tar_data=None,
                 is_eval=False):
        w, b = self.params["w"], self.params["b"]
        use_aug = (aug_src_data is not None and aug_tar_data is not None
                   and not is_eval)
        inputs = [src_data, tar_data]
        if use_aug:
            inputs += [aug_src_data, aug_tar_data]
        if all(x.shape == src_data.shape for x in inputs):
            # One pallas_call for all streams: amortize dispatch, more grid
            # steps for megacore when per-stream batch is tiny.
            stacked = jnp.concatenate(inputs, axis=0)
            feats = conv1x1_nchw(stacked, w, b)
            B = src_data.shape[0]
            outs = tuple(feats[i * B:(i + 1) * B] for i in range(len(inputs)))
        else:
            outs = tuple(conv1x1_nchw(x, w, b) for x in inputs)
        return outs


# ----------------------------------------------------------------------------
# ModelEMA (JAX/Pallas version)
# ----------------------------------------------------------------------------
class ModelEMA:
    def __init__(self, model, decay=0.9999, device=False):
        self.decay = float(decay)
        self.device = device  # device placement handled by JAX; no-op here
        # Real deepcopy of the wrapped model's parameters (fresh buffers).
        params = jax.tree_util.tree_map(jnp.copy, model.params)
        self.module = SyntheticModel(params)
        # Pack all leaves once into a flat, lane-dense f32 master buffer.
        leaves, self._treedef = jax.tree_util.tree_flatten(params)
        self._shapes = [l.shape for l in leaves]
        self._dtypes = [l.dtype for l in leaves]
        self._sizes = [int(l.size) for l in leaves]
        total = sum(self._sizes)
        self._padded = pl.cdiv(max(total, 1), _EMA_PAD) * _EMA_PAD
        self._packed = self._pack(leaves)

    def _pack(self, leaves):
        flat = jnp.concatenate([jnp.ravel(l).astype(jnp.float32) for l in leaves])
        return jnp.pad(flat, (0, self._padded - flat.size))

    def _unpack(self, packed):
        leaves, off = [], 0
        for shape, dtype, size in zip(self._shapes, self._dtypes, self._sizes):
            leaves.append(packed[off:off + size].reshape(shape).astype(dtype))
            off += size
        return jax.tree_util.tree_unflatten(self._treedef, leaves)

    def forward(self, src_data, tar_data, aug_src_data=None, aug_tar_data=None,
                is_eval=False):
        return self.module(src_data, tar_data, aug_src_data, aug_tar_data, is_eval)

    __call__ = forward

    def update_parameters(self, model):
        # Single jitted dispatch -> single fused Pallas EMA sweep over the
        # packed f32 master buffer (donated, aliased => in-place in HBM).
        new_leaves = jax.tree_util.tree_leaves(model.params)
        self._packed = _ema_update_packed(self._packed, new_leaves, self.decay)
        # Refresh the unpacked view the forward pass uses.
        self.module.params = self._unpack(self._packed)
        # TODO(synk): module.buffers() copy — the synthetic model defines no
        # buffers, so there is nothing to kernelize.

    def state_dict(self):
        return self.module.params

    def load_state_dict(self, state_dict):
        params = jax.tree_util.tree_map(jnp.copy, state_dict)
        self.module.params = params
        self._packed = self._pack(jax.tree_util.tree_leaves(params))


# ----------------------------------------------------------------------------
# Main
# ----------------------------------------------------------------------------
if __name__ == "__main__":
    key = jax.random.PRNGKey(0)
    k_w, k_b, k_w2, k_b2, k_src, k_tar = jax.random.split(key, 6)

    B, Cin, H, W = 2, 4, 16, 16
    Cout = 8

    # deterministic "trained" model and its EMA copy
    base_params = {
        "w": jax.random.normal(k_w, (Cin, Cout), jnp.float32) * 0.1,
        "b": jax.random.normal(k_b, (Cout,), jnp.float32) * 0.1,
    }
    base_model = SyntheticModel(base_params)
    ema = ModelEMA(base_model, decay=0.9999)

    # forward pass through the EMA module (Pallas VPU conv kernel)
    src = jax.random.normal(k_src, (B, Cin, H, W), jnp.float32)
    tar = jax.random.normal(k_tar, (B, Cin, H, W), jnp.float32)
    feat_src, feat_tar = ema(src, tar, is_eval=True)
    jax.block_until_ready((feat_src, feat_tar))

    # reference check for the forward kernel
    def ref_fwd(x, p):
        return jnp.einsum("bchw,co->bohw", x, p["w"]) + p["b"][None, :, None, None]

    assert jnp.allclose(feat_src, ref_fwd(src, ema.module.params), atol=1e-5)
    assert jnp.allclose(feat_tar, ref_fwd(tar, ema.module.params), atol=1e-5)

    # simulate a training step on the wrapped model, then EMA-update (Pallas kernel)
    new_params = {
        "w": base_params["w"] + 0.05 * jax.random.normal(k_w2, (Cin, Cout), jnp.float32),
        "b": base_params["b"] + 0.05 * jax.random.normal(k_b2, (Cout,), jnp.float32),
    }
    student = SyntheticModel(new_params)
    ema.update_parameters(student)
    jax.block_until_ready(ema.module.params)

    # reference check for the EMA kernel
    d = ema.decay
    ref_w = d * base_params["w"] + (1.0 - d) * new_params["w"]
    ref_b = d * base_params["b"] + (1.0 - d) * new_params["b"]
    assert jnp.allclose(ema.module.params["w"], ref_w, atol=1e-6)
    assert jnp.allclose(ema.module.params["b"], ref_b, atol=1e-6)

    # second update with a different decay (must not recompile; traced scalar)
    ema.decay = 0.99
    ema.update_parameters(student)
    jax.block_until_ready(ema.module.params)
    ref_w2 = 0.99 * ref_w + 0.01 * new_params["w"]
    assert jnp.allclose(ema.module.params["w"], ref_w2, atol=1e-6)

    print("KERNEL_OK")
</pallas_src>

<mosaic_0001>
module attributes {stable_mosaic.version = 11 : i64} {
  func.func @_conv1x1_kernel(%arg0: i32, %arg1: i32, %arg2: memref<1x4x2x128xf32, #tpu.memory_space<vmem>>, %arg3: memref<4x8xf32, #tpu.memory_space<smem>>, %arg4: memref<8xf32, #tpu.memory_space<smem>>, %arg5: memref<1x8x2x128xf32, #tpu.memory_space<vmem>>) attributes {dimension_semantics = [#tpu.dimension_semantics<parallel>, #tpu.dimension_semantics<parallel>], iteration_bounds = array<i64: 4, 1>, scalar_prefetch = 0 : i64, scratch_operands = 0 : i64, tpu.core_type = #tpu.core_type<tc>, window_params = [{transform_indices = @transform_0, window_bounds = array<i64: 1, 4, 2, 128>}, {transform_indices = @transform_1, window_bounds = array<i64: 4, 8>}, {transform_indices = @transform_2, window_bounds = array<i64: 8>}, {transform_indices = @transform_3, window_bounds = array<i64: 1, 8, 2, 128>}]} {
    %c0 = arith.constant 0 : index
    %0 = memref.load %arg4[%c0] : memref<8xf32, #tpu.memory_space<smem>>
    %1 = vector.broadcast %0 : f32 to vector<2x128xf32>
    %c0_0 = arith.constant 0 : index
    %c0_1 = arith.constant 0 : index
    %2 = memref.load %arg3[%c0_0, %c0_1] : memref<4x8xf32, #tpu.memory_space<smem>>
    %c0_2 = arith.constant 0 : index
    %c0_3 = arith.constant 0 : index
    %c0_4 = arith.constant 0 : index
    %c0_5 = arith.constant 0 : index
    %3 = vector.load %arg2[%c0_2, %c0_3, %c0_4, %c0_5] : memref<1x4x2x128xf32, #tpu.memory_space<vmem>>, vector<1x1x2x128xf32>
    %4 = vector.shape_cast %3 : vector<1x1x2x128xf32> to vector<2x128xf32>
    %5 = vector.broadcast %2 : f32 to vector<2x128xf32>
    %6 = arith.mulf %5, %4 : vector<2x128xf32>
    %7 = arith.addf %1, %6 : vector<2x128xf32>
    %c1 = arith.constant 1 : index
    %c0_6 = arith.constant 0 : index
    %8 = memref.load %arg3[%c1, %c0_6] : memref<4x8xf32, #tpu.memory_space<smem>>
    %c0_7 = arith.constant 0 : index
    %c1_8 = arith.constant 1 : index
    %c0_9 = arith.constant 0 : index
    %c0_10 = arith.constant 0 : index
    %9 = vector.load %arg2[%c0_7, %c1_8, %c0_9, %c0_10] : memref<1x4x2x128xf32, #tpu.memory_space<vmem>>, vector<1x1x2x128xf32>
    %10 = vector.shape_cast %9 : vector<1x1x2x128xf32> to vector<2x128xf32>
    %11 = vector.broadcast %8 : f32 to vector<2x128xf32>
    %12 = arith.mulf %11, %10 : vector<2x128xf32>
    %13 = arith.addf %7, %12 : vector<2x128xf32>
    %c2 = arith.constant 2 : index
    %c0_11 = arith.constant 0 : index
    %14 = memref.load %arg3[%c2, %c0_11] : memref<4x8xf32, #tpu.memory_space<smem>>
    %c0_12 = arith.constant 0 : index
    %c2_13 = arith.constant 2 : index
    %c0_14 = arith.constant 0 : index
    %c0_15 = arith.constant 0 : index
    %15 = vector.load %arg2[%c0_12, %c2_13, %c0_14, %c0_15] : memref<1x4x2x128xf32, #tpu.memory_space<vmem>>, vector<1x1x2x128xf32>
    %16 = vector.shape_cast %15 : vector<1x1x2x128xf32> to vector<2x128xf32>
    %17 = vector.broadcast %14 : f32 to vector<2x128xf32>
    %18 = arith.mulf %17, %16 : vector<2x128xf32>
    %19 = arith.addf %13, %18 : vector<2x128xf32>
    %c3 = arith.constant 3 : index
    %c0_16 = arith.constant 0 : index
    %20 = memref.load %arg3[%c3, %c0_16] : memref<4x8xf32, #tpu.memory_space<smem>>
    %c0_17 = arith.constant 0 : index
    %c3_18 = arith.constant 3 : index
    %c0_19 = arith.constant 0 : index
    %c0_20 = arith.constant 0 : index
    %21 = vector.load %arg2[%c0_17, %c3_18, %c0_19, %c0_20] : memref<1x4x2x128xf32, #tpu.memory_space<vmem>>, vector<1x1x2x128xf32>
    %22 = vector.shape_cast %21 : vector<1x1x2x128xf32> to vector<2x128xf32>
    %23 = vector.broadcast %20 : f32 to vector<2x128xf32>
    %24 = arith.mulf %23, %22 : vector<2x128xf32>
    %25 = arith.addf %19, %24 : vector<2x128xf32>
    %c0_21 = arith.constant 0 : index
    %c0_22 = arith.constant 0 : index
    %c0_23 = arith.constant 0 : index
    %c0_24 = arith.constant 0 : index
    %26 = vector.load %arg5[%c0_21, %c0_22, %c0_23, %c0_24] : memref<1x8x2x128xf32, #tpu.memory_space<vmem>>, vector<1x1x2x128xf32>
    %27 = vector.shape_cast %26 : vector<1x1x2x128xf32> to vector<2x128xf32>
    %28 = vector.shape_cast %25 : vector<2x128xf32> to vector<1x1x2x128xf32>
    tpu.vector_store %arg5[%c0_21, %c0_22, %c0_23, %c0_24], %28 {strides = array<i32>} : memref<1x8x2x128xf32, #tpu.memory_space<vmem>>, vector<1x1x2x128xf32>,
    %c1_25 = arith.constant 1 : index
    %29 = memref.load %arg4[%c1_25] : memref<8xf32, #tpu.memory_space<smem>>
    %30 = vector.broadcast %29 : f32 to vector<2x128xf32>
    %c0_26 = arith.constant 0 : index
    %c1_27 = arith.constant 1 : index
    %31 = memref.load %arg3[%c0_26, %c1_27] : memref<4x8xf32, #tpu.memory_space<smem>>
    %c0_28 = arith.constant 0 : index
    %c0_29 = arith.constant 0 : index
    %c0_30 = arith.constant 0 : index
    %c0_31 = arith.constant 0 : index
    %32 = vector.load %arg2[%c0_28, %c0_29, %c0_30, %c0_31] : memref<1x4x2x128xf32, #tpu.memory_space<vmem>>, vector<1x1x2x128xf32>
    %33 = vector.shape_cast %32 : vector<1x1x2x128xf32> to vector<2x128xf32>
    %34 = vector.broadcast %31 : f32 to vector<2x128xf32>
    %35 = arith.mulf %34, %33 : vector<2x128xf32>
    %36 = arith.addf %30, %35 : vector<2x128xf32>
    %c1_32 = arith.constant 1 : index
    %c1_33 = arith.constant 1 : index
    %37 = memref.load %arg3[%c1_32, %c1_33] : memref<4x8xf32, #tpu.memory_space<smem>>
    %c0_34 = arith.constant 0 : index
    %c1_35 = arith.constant 1 : index
    %c0_36 = arith.constant 0 : index
    %c0_37 = arith.constant 0 : index
    %38 = vector.load %arg2[%c0_34, %c1_35, %c0_36, %c0_37] : memref<1x4x2x128xf32, #tpu.memory_space<vmem>>, vector<1x1x2x128xf32>
    %39 = vector.shape_cast %38 : vector<1x1x2x128xf32> to vector<2x128xf32>
    %40 = vector.broadcast %37 : f32 to vector<2x128xf32>
    %41 = arith.mulf %40, %39 : vector<2x128xf32>
    %42 = arith.addf %36, %41 : vector<2x128xf32>
    %c2_38 = arith.constant 2 : index
    %c1_39 = arith.constant 1 : index
    %43 = memref.load %arg3[%c2_38, %c1_39] : memref<4x8xf32, #tpu.memory_space<smem>>
    %c0_40 = arith.constant 0 : index
    %c2_41 = arith.constant 2 : index
    %c0_42 = arith.constant 0 : index
    %c0_43 = arith.constant 0 : index
    %44 = vector.load %arg2[%c0_40, %c2_41, %c0_42, %c0_43] : memref<1x4x2x128xf32, #tpu.memory_space<vmem>>, vector<1x1x2x128xf32>
    %45 = vector.shape_cast %44 : vector<1x1x2x128xf32> to vector<2x128xf32>
    %46 = vector.broadcast %43 : f32 to vector<2x128xf32>
    %47 = arith.mulf %46, %45 : vector<2x128xf32>
    %48 = arith.addf %42, %47 : vector<2x128xf32>
    %c3_44 = arith.constant 3 : index
    %c1_45 = arith.constant 1 : index
    %49 = memref.load %arg3[%c3_44, %c1_45] : memref<4x8xf32, #tpu.memory_space<smem>>
    %c0_46 = arith.constant 0 : index
    %c3_47 = arith.constant 3 : index
    %c0_48 = arith.constant 0 : index
    %c0_49 = arith.constant 0 : index
    %50 = vector.load %arg2[%c0_46, %c3_47, %c0_48, %c0_49] : memref<1x4x2x128xf32, #tpu.memory_space<vmem>>, vector<1x1x2x128xf32>
    %51 = vector.shape_cast %50 : vector<1x1x2x128xf32> to vector<2x128xf32>
    %52 = vector.broadcast %49 : f32 to vector<2x128xf32>
    %53 = arith.mulf %52, %51 : vector<2x128xf32>
    %54 = arith.addf %48, %53 : vector<2x128xf32>
    %c0_50 = arith.constant 0 : index
    %c1_51 = arith.constant 1 : index
    %c0_52 = arith.constant 0 : index
    %c0_53 = arith.constant 0 : index
    %55 = vector.load %arg5[%c0_50, %c1_51, %c0_52, %c0_53] : memref<1x8x2x128xf32, #tpu.memory_space<vmem>>, vector<1x1x2x128xf32>
    %56 = vector.shape_cast %55 : vector<1x1x2x128xf32> to vector<2x128xf32>
    %57 = vector.shape_cast %54 : vector<2x128xf32> to vector<1x1x2x128xf32>
    tpu.vector_store %arg5[%c0_50, %c1_51, %c0_52, %c0_53], %57 {strides = array<i32>} : memref<1x8x2x128xf32, #tpu.memory_space<vmem>>, vector<1x1x2x128xf32>,
    %c2_54 = arith.constant 2 : index
    %58 = memref.load %arg4[%c2_54] : memref<8xf32, #tpu.memory_space<smem>>
    %59 = vector.broadcast %58 : f32 to vector<2x128xf32>
    %c0_55 = arith.constant 0 : index
    %c2_56 = arith.constant 2 : index
    %60 = memref.load %arg3[%c0_55, %c2_56] : memref<4x8xf32, #tpu.memory_space<smem>>
    %c0_57 = arith.constant 0 : index
    %c0_58 = arith.constant 0 : index
    %c0_59 = arith.constant 0 : index
    %c0_60 = arith.constant 0 : index
    %61 = vector.load %arg2[%c0_57, %c0_58, %c0_59, %c0_60] : memref<1x4x2x128xf32, #tpu.memory_space<vmem>>, vector<1x1x2x128xf32>
    %62 = vector.shape_cast %61 : vector<1x1x2x128xf32> to vector<2x128xf32>
    %63 = vector.broadcast %60 : f32 to vector<2x128xf32>
    %64 = arith.mulf %63, %62 : vector<2x128xf32>
    %65 = arith.addf %59, %64 : vector<2x128xf32>
    %c1_61 = arith.constant 1 : index
    %c2_62 = arith.constant 2 : index
    %66 = memref.load %arg3[%c1_61, %c2_62] : memref<4x8xf32, #tpu.memory_space<smem>>
    %c0_63 = arith.constant 0 : index
    %c1_64 = arith.constant 1 : index
    %c0_65 = arith.constant 0 : index
    %c0_66 = arith.constant 0 : index
    %67 = vector.load %arg2[%c0_63, %c1_64, %c0_65, %c0_66] : memref<1x4x2x128xf32, #tpu.memory_space<vmem>>, vector<1x1x2x128xf32>
    %68 = vector.shape_cast %67 : vector<1x1x2x128xf32> to vector<2x128xf32>
    %69 = vector.broadcast %66 : f32 to vector<2x128xf32>
    %70 = arith.mulf %69, %68 : vector<2x128xf32>
    %71 = arith.addf %65, %70 : vector<2x128xf32>
    %c2_67 = arith.constant 2 : index
    %c2_68 = arith.constant 2 : index
    %72 = memref.load %arg3[%c2_67, %c2_68] : memref<4x8xf32, #tpu.memory_space<smem>>
    %c0_69 = arith.constant 0 : index
    %c2_70 = arith.constant 2 : index
    %c0_71 = arith.constant 0 : index
    %c0_72 = arith.constant 0 : index
    %73 = vector.load %arg2[%c0_69, %c2_70, %c0_71, %c0_72] : memref<1x4x2x128xf32, #tpu.memory_space<vmem>>, vector<1x1x2x128xf32>
    %74 = vector.shape_cast %73 : vector<1x1x2x128xf32> to vector<2x128xf32>
    %75 = vector.broadcast %72 : f32 to vector<2x128xf32>
    %76 = arith.mulf %75, %74 : vector<2x128xf32>
    %77 = arith.addf %71, %76 : vector<2x128xf32>
    %c3_73 = arith.constant 3 : index
    %c2_74 = arith.constant 2 : index
    %78 = memref.load %arg3[%c3_73, %c2_74] : memref<4x8xf32, #tpu.memory_space<smem>>
    %c0_75 = arith.constant 0 : index
    %c3_76 = arith.constant 3 : index
    %c0_77 = arith.constant 0 : index
    %c0_78 = arith.constant 0 : index
    %79 = vector.load %arg2[%c0_75, %c3_76, %c0_77, %c0_78] : memref<1x4x2x128xf32, #tpu.memory_space<vmem>>, vector<1x1x2x128xf32>
    %80 = vector.shape_cast %79 : vector<1x1x2x128xf32> to vector<2x128xf32>
    %81 = vector.broadcast %78 : f32 to vector<2x128xf32>
    %82 = arith.mulf %81, %80 : vector<2x128xf32>
    %83 = arith.addf %77, %82 : vector<2x128xf32>
    %c0_79 = arith.constant 0 : index
    %c2_80 = arith.constant 2 : index
    %c0_81 = arith.constant 0 : index
    %c0_82 = arith.constant 0 : index
    %84 = vector.load %arg5[%c0_79, %c2_80, %c0_81, %c0_82] : memref<1x8x2x128xf32, #tpu.memory_space<vmem>>, vector<1x1x2x128xf32>
    %85 = vector.shape_cast %84 : vector<1x1x2x128xf32> to vector<2x128xf32>
    %86 = vector.shape_cast %83 : vector<2x128xf32> to vector<1x1x2x128xf32>
    tpu.vector_store %arg5[%c0_79, %c2_80, %c0_81, %c0_82], %86 {strides = array<i32>} : memref<1x8x2x128xf32, #tpu.memory_space<vmem>>, vector<1x1x2x128xf32>,
    %c3_83 = arith.constant 3 : index
    %87 = memref.load %arg4[%c3_83] : memref<8xf32, #tpu.memory_space<smem>>
    %88 = vector.broadcast %87 : f32 to vector<2x128xf32>
    %c0_84 = arith.constant 0 : index
    %c3_85 = arith.constant 3 : index
    %89 = memref.load %arg3[%c0_84, %c3_85] : memref<4x8xf32, #tpu.memory_space<smem>>
    %c0_86 = arith.constant 0 : index
    %c0_87 = arith.constant 0 : index
    %c0_88 = arith.constant 0 : index
    %c0_89 = arith.constant 0 : index
    %90 = vector.load %arg2[%c0_86, %c0_87, %c0_88, %c0_89] : memref<1x4x2x128xf32, #tpu.memory_space<vmem>>, vector<1x1x2x128xf32>
    %91 = vector.shape_cast %90 : vector<1x1x2x128xf32> to vector<2x128xf32>
    %92 = vector.broadcast %89 : f32 to vector<2x128xf32>
    %93 = arith.mulf %92, %91 : vector<2x128xf32>
    %94 = arith.addf %88, %93 : vector<2x128xf32>
    %c1_90 = arith.constant 1 : index
    %c3_91 = arith.constant 3 : index
    %95 = memref.load %arg3[%c1_90, %c3_91] : memref<4x8xf32, #tpu.memory_space<smem>>
    %c0_92 = arith.constant 0 : index
    %c1_93 = arith.constant 1 : index
    %c0_94 = arith.constant 0 : index
    %c0_95 = arith.constant 0 : index
    %96 = vector.load %arg2[%c0_92, %c1_93, %c0_94, %c0_95] : memref<1x4x2x128xf32, #tpu.memory_space<vmem>>, vector<1x1x2x128xf32>
    %97 = vector.shape_cast %96 : vector<1x1x2x128xf32> to vector<2x128xf32>
    %98 = vector.broadcast %95 : f32 to vector<2x128xf32>
    %99 = arith.mulf %98, %97 : vector<2x128xf32>
    %100 = arith.addf %94, %99 : vector<2x128xf32>
    %c2_96 = arith.constant 2 : index
    %c3_97 = arith.constant 3 : index
    %101 = memref.load %arg3[%c2_96, %c3_97] : memref<4x8xf32, #tpu.memory_space<smem>>
    %c0_98 = arith.constant 0 : index
    %c2_99 = arith.constant 2 : index
    %c0_100 = arith.constant 0 : index
    %c0_101 = arith.constant 0 : index
    %102 = vector.load %arg2[%c0_98, %c2_99, %c0_100, %c0_101] : memref<1x4x2x128xf32, #tpu.memory_space<vmem>>, vector<1x1x2x128xf32>
    %103 = vector.shape_cast %102 : vector<1x1x2x128xf32> to vector<2x128xf32>
    %104 = vector.broadcast %101 : f32 to vector<2x128xf32>
    %105 = arith.mulf %104, %103 : vector<2x128xf32>
    %106 = arith.addf %100, %105 : vector<2x128xf32>
    %c3_102 = arith.constant 3 : index
    %c3_103 = arith.constant 3 : index
    %107 = memref.load %arg3[%c3_102, %c3_103] : memref<4x8xf32, #tpu.memory_space<smem>>
    %c0_104 = arith.constant 0 : index
    %c3_105 = arith.constant 3 : index
    %c0_106 = arith.constant 0 : index
    %c0_107 = arith.constant 0 : index
    %108 = vector.load %arg2[%c0_104, %c3_105, %c0_106, %c0_107] : memref<1x4x2x128xf32, #tpu.memory_space<vmem>>, vector<1x1x2x128xf32>
    %109 = vector.shape_cast %108 : vector<1x1x2x128xf32> to vector<2x128xf32>
    %110 = vector.broadcast %107 : f32 to vector<2x128xf32>
    %111 = arith.mulf %110, %109 : vector<2x128xf32>
    %112 = arith.addf %106, %111 : vector<2x128xf32>
    %c0_108 = arith.constant 0 : index
    %c3_109 = arith.constant 3 : index
    %c0_110 = arith.constant 0 : index
    %c0_111 = arith.constant 0 : index
    %113 = vector.load %arg5[%c0_108, %c3_109, %c0_110, %c0_111] : memref<1x8x2x128xf32, #tpu.memory_space<vmem>>, vector<1x1x2x128xf32>
    %114 = vector.shape_cast %113 : vector<1x1x2x128xf32> to vector<2x128xf32>
    %115 = vector.shape_cast %112 : vector<2x128xf32> to vector<1x1x2x128xf32>
    tpu.vector_store %arg5[%c0_108, %c3_109, %c0_110, %c0_111], %115 {strides = array<i32>} : memref<1x8x2x128xf32, #tpu.memory_space<vmem>>, vector<1x1x2x128xf32>,
    %c4 = arith.constant 4 : index
    %116 = memref.load %arg4[%c4] : memref<8xf32, #tpu.memory_space<smem>>
    %117 = vector.broadcast %116 : f32 to vector<2x128xf32>
    %c0_112 = arith.constant 0 : index
    %c4_113 = arith.constant 4 : index
    %118 = memref.load %arg3[%c0_112, %c4_113] : memref<4x8xf32, #tpu.memory_space<smem>>
    %c0_114 = arith.constant 0 : index
    %c0_115 = arith.constant 0 : index
    %c0_116 = arith.constant 0 : index
    %c0_117 = arith.constant 0 : index
    %119 = vector.load %arg2[%c0_114, %c0_115, %c0_116, %c0_117] : memref<1x4x2x128xf32, #tpu.memory_space<vmem>>, vector<1x1x2x128xf32>
    %120 = vector.shape_cast %119 : vector<1x1x2x128xf32> to vector<2x128xf32>
    %121 = vector.broadcast %118 : f32 to vector<2x128xf32>
    %122 = arith.mulf %121, %120 : vector<2x128xf32>
    %123 = arith.addf %117, %122 : vector<2x128xf32>
    %c1_118 = arith.constant 1 : index
    %c4_119 = arith.constant 4 : index
    %124 = memref.load %arg3[%c1_118, %c4_119] : memref<4x8xf32, #tpu.memory_space<smem>>
    %c0_120 = arith.constant 0 : index
    %c1_121 = arith.constant 1 : index
    %c0_122 = arith.constant 0 : index
    %c0_123 = arith.constant 0 : index
    %125 = vector.load %arg2[%c0_120, %c1_121, %c0_122, %c0_123] : memref<1x4x2x128xf32, #tpu.memory_space<vmem>>, vector<1x1x2x128xf32>
    %126 = vector.shape_cast %125 : vector<1x1x2x128xf32> to vector<2x128xf32>
    %127 = vector.broadcast %124 : f32 to vector<2x128xf32>
    %128 = arith.mulf %127, %126 : vector<2x128xf32>
    %129 = arith.addf %123, %128 : vector<2x128xf32>
    %c2_124 = arith.constant 2 : index
    %c4_125 = arith.constant 4 : index
    %130 = memref.load %arg3[%c2_124, %c4_125] : memref<4x8xf32, #tpu.memory_space<smem>>
    %c0_126 = arith.constant 0 : index
    %c2_127 = arith.constant 2 : index
    %c0_128 = arith.constant 0 : index
    %c0_129 = arith.constant 0 : index
    %131 = vector.load %arg2[%c0_126, %c2_127, %c0_128, %c0_129] : memref<1x4x2x128xf32, #tpu.memory_space<vmem>>, vector<1x1x2x128xf32>
    %132 = vector.shape_cast %131 : vector<1x1x2x128xf32> to vector<2x128xf32>
    %133 = vector.broadcast %130 : f32 to vector<2x128xf32>
    %134 = arith.mulf %133, %132 : vector<2x128xf32>
    %135 = arith.addf %129, %134 : vector<2x128xf32>
    %c3_130 = arith.constant 3 : index
    %c4_131 = arith.constant 4 : index
    %136 = memref.load %arg3[%c3_130, %c4_131] : memref<4x8xf32, #tpu.memory_space<smem>>
    %c0_132 = arith.constant 0 : index
    %c3_133 = arith.constant 3 : index
    %c0_134 = arith.constant 0 : index
    %c0_135 = arith.constant 0 : index
    %137 = vector.load %arg2[%c0_132, %c3_133, %c0_134, %c0_135] : memref<1x4x2x128xf32, #tpu.memory_space<vmem>>, vector<1x1x2x128xf32>
    %138 = vector.shape_cast %137 : vector<1x1x2x128xf32> to vector<2x128xf32>
    %139 = vector.broadcast %136 : f32 to vector<2x128xf32>
    %140 = arith.mulf %139, %138 : vector<2x128xf32>
    %141 = arith.addf %135, %140 : vector<2x128xf32>
    %c0_136 = arith.constant 0 : index
    %c4_137 = arith.constant 4 : index
    %c0_138 = arith.constant 0 : index
    %c0_139 = arith.constant 0 : index
    %142 = vector.load %arg5[%c0_136, %c4_137, %c0_138, %c0_139] : memref<1x8x2x128xf32, #tpu.memory_space<vmem>>, vector<1x1x2x128xf32>
    %143 = vector.shape_cast %142 : vector<1x1x2x128xf32> to vector<2x128xf32>
    %144 = vector.shape_cast %141 : vector<2x128xf32> to vector<1x1x2x128xf32>
    tpu.vector_store %arg5[%c0_136, %c4_137, %c0_138, %c0_139], %144 {strides = array<i32>} : memref<1x8x2x128xf32, #tpu.memory_space<vmem>>, vector<1x1x2x128xf32>,
    %c5 = arith.constant 5 : index
    %145 = memref.load %arg4[%c5] : memref<8xf32, #tpu.memory_space<smem>>
    %146 = vector.broadcast %145 : f32 to vector<2x128xf32>
    %c0_140 = arith.constant 0 : index
    %c5_141 = arith.constant 5 : index
    %147 = memref.load %arg3[%c0_140, %c5_141] : memref<4x8xf32, #tpu.memory_space<smem>>
    %c0_142 = arith.constant 0 : index
    %c0_143 = arith.constant 0 : index
    %c0_144 = arith.constant 0 : index
    %c0_145 = arith.constant 0 : index
    %148 = vector.load %arg2[%c0_142, %c0_143, %c0_144, %c0_145] : memref<1x4x2x128xf32, #tpu.memory_space<vmem>>, vector<1x1x2x128xf32>
    %149 = vector.shape_cast %148 : vector<1x1x2x128xf32> to vector<2x128xf32>
    %150 = vector.broadcast %147 : f32 to vector<2x128xf32>
    %151 = arith.mulf %150, %149 : vector<2x128xf32>
    %152 = arith.addf %146, %151 : vector<2x128xf32>
    %c1_146 = arith.constant 1 : index
    %c5_147 = arith.constant 5 : index
    %153 = memref.load %arg3[%c1_146, %c5_147] : memref<4x8xf32, #tpu.memory_space<smem>>
    %c0_148 = arith.constant 0 : index
    %c1_149 = arith.constant 1 : index
    %c0_150 = arith.constant 0 : index
    %c0_151 = arith.constant 0 : index
    %154 = vector.load %arg2[%c0_148, %c1_149, %c0_150, %c0_151] : memref<1x4x2x128xf32, #tpu.memory_space<vmem>>, vector<1x1x2x128xf32>
    %155 = vector.shape_cast %154 : vector<1x1x2x128xf32> to vector<2x128xf32>
    %156 = vector.broadcast %153 : f32 to vector<2x128xf32>
    %157 = arith.mulf %156, %155 : vector<2x128xf32>
    %158 = arith.addf %152, %157 : vector<2x128xf32>
    %c2_152 = arith.constant 2 : index
    %c5_153 = arith.constant 5 : index
    %159 = memref.load %arg3[%c2_152, %c5_153] : memref<4x8xf32, #tpu.memory_space<smem>>
    %c0_154 = arith.constant 0 : index
    %c2_155 = arith.constant 2 : index
    %c0_156 = arith.constant 0 : index
    %c0_157 = arith.constant 0 : index
    %160 = vector.load %arg2[%c0_154, %c2_155, %c0_156, %c0_157] : memref<1x4x2x128xf32, #tpu.memory_space<vmem>>, vector<1x1x2x128xf32>
    %161 = vector.shape_cast %160 : vector<1x1x2x128xf32> to vector<2x128xf32>
    %162 = vector.broadcast %159 : f32 to vector<2x128xf32>
    %163 = arith.mulf %162, %161 : vector<2x128xf32>
    %164 = arith.addf %158, %163 : vector<2x128xf32>
    %c3_158 = arith.constant 3 : index
    %c5_159 = arith.constant 5 : index
    %165 = memref.load %arg3[%c3_158, %c5_159] : memref<4x8xf32, #tpu.memory_space<smem>>
    %c0_160 = arith.constant 0 : index
    %c3_161 = arith.constant 3 : index
    %c0_162 = arith.constant 0 : index
    %c0_163 = arith.constant 0 : index
    %166 = vector.load %arg2[%c0_160, %c3_161, %c0_162, %c0_163] : memref<1x4x2x128xf32, #tpu.memory_space<vmem>>, vector<1x1x2x128xf32>
    %167 = vector.shape_cast %166 : vector<1x1x2x128xf32> to vector<2x128xf32>
    %168 = vector.broadcast %165 : f32 to vector<2x128xf32>
    %169 = arith.mulf %168, %167 : vector<2x128xf32>
    %170 = arith.addf %164, %169 : vector<2x128xf32>
    %c0_164 = arith.constant 0 : index
    %c5_165 = arith.constant 5 : index
    %c0_166 = arith.constant 0 : index
    %c0_167 = arith.constant 0 : index
    %171 = vector.load %arg5[%c0_164, %c5_165, %c0_166, %c0_167] : memref<1x8x2x128xf32, #tpu.memory_space<vmem>>, vector<1x1x2x128xf32>
    %172 = vector.shape_cast %171 : vector<1x1x2x128xf32> to vector<2x128xf32>
    %173 = vector.shape_cast %170 : vector<2x128xf32> to vector<1x1x2x128xf32>
    tpu.vector_store %arg5[%c0_164, %c5_165, %c0_166, %c0_167], %173 {strides = array<i32>} : memref<1x8x2x128xf32, #tpu.memory_space<vmem>>, vector<1x1x2x128xf32>,
    %c6 = arith.constant 6 : index
    %174 = memref.load %arg4[%c6] : memref<8xf32, #tpu.memory_space<smem>>
    %175 = vector.broadcast %174 : f32 to vector<2x128xf32>
    %c0_168 = arith.constant 0 : index
    %c6_169 = arith.constant 6 : index
    %176 = memref.load %arg3[%c0_168, %c6_169] : memref<4x8xf32, #tpu.memory_space<smem>>
    %c0_170 = arith.constant 0 : index
    %c0_171 = arith.constant 0 : index
    %c0_172 = arith.constant 0 : index
    %c0_173 = arith.constant 0 : index
    %177 = vector.load %arg2[%c0_170, %c0_171, %c0_172, %c0_173] : memref<1x4x2x128xf32, #tpu.memory_space<vmem>>, vector<1x1x2x128xf32>
    %178 = vector.shape_cast %177 : vector<1x1x2x128xf32> to vector<2x128xf32>
    %179 = vector.broadcast %176 : f32 to vector<2x128xf32>
    %180 = arith.mulf %179, %178 : vector<2x128xf32>
    %181 = arith.addf %175, %180 : vector<2x128xf32>
    %c1_174 = arith.constant 1 : index
    %c6_175 = arith.constant 6 : index
    %182 = memref.load %arg3[%c1_174, %c6_175] : memref<4x8xf32, #tpu.memory_space<smem>>
    %c0_176 = arith.constant 0 : index
    %c1_177 = arith.constant 1 : index
    %c0_178 = arith.constant 0 : index
    %c0_179 = arith.constant 0 : index
    %183 = vector.load %arg2[%c0_176, %c1_177, %c0_178, %c0_179] : memref<1x4x2x128xf32, #tpu.memory_space<vmem>>, vector<1x1x2x128xf32>
    %184 = vector.shape_cast %183 : vector<1x1x2x128xf32> to vector<2x128xf32>
    %185 = vector.broadcast %182 : f32 to vector<2x128xf32>
    %186 = arith.mulf %185, %184 : vector<2x128xf32>
    %187 = arith.addf %181, %186 : vector<2x128xf32>
    %c2_180 = arith.constant 2 : index
    %c6_181 = arith.constant 6 : index
    %188 = memref.load %arg3[%c2_180, %c6_181] : memref<4x8xf32, #tpu.memory_space<smem>>
    %c0_182 = arith.constant 0 : index
    %c2_183 = arith.constant 2 : index
    %c0_184 = arith.constant 0 : index
    %c0_185 = arith.constant 0 : index
    %189 = vector.load %arg2[%c0_182, %c2_183, %c0_184, %c0_185] : memref<1x4x2x128xf32, #tpu.memory_space<vmem>>, vector<1x1x2x128xf32>
    %190 = vector.shape_cast %189 : vector<1x1x2x128xf32> to vector<2x128xf32>
    %191 = vector.broadcast %188 : f32 to vector<2x128xf32>
    %192 = arith.mulf %191, %190 : vector<2x128xf32>
    %193 = arith.addf %187, %192 : vector<2x128xf32>
    %c3_186 = arith.constant 3 : index
    %c6_187 = arith.constant 6 : index
    %194 = memref.load %arg3[%c3_186, %c6_187] : memref<4x8xf32, #tpu.memory_space<smem>>
    %c0_188 = arith.constant 0 : index
    %c3_189 = arith.constant 3 : index
    %c0_190 = arith.constant 0 : index
    %c0_191 = arith.constant 0 : index
    %195 = vector.load %arg2[%c0_188, %c3_189, %c0_190, %c0_191] : memref<1x4x2x128xf32, #tpu.memory_space<vmem>>, vector<1x1x2x128xf32>
    %196 = vector.shape_cast %195 : vector<1x1x2x128xf32> to vector<2x128xf32>
    %197 = vector.broadcast %194 : f32 to vector<2x128xf32>
    %198 = arith.mulf %197, %196 : vector<2x128xf32>
    %199 = arith.addf %193, %198 : vector<2x128xf32>
    %c0_192 = arith.constant 0 : index
    %c6_193 = arith.constant 6 : index
    %c0_194 = arith.constant 0 : index
    %c0_195 = arith.constant 0 : index
    %200 = vector.load %arg5[%c0_192, %c6_193, %c0_194, %c0_195] : memref<1x8x2x128xf32, #tpu.memory_space<vmem>>, vector<1x1x2x128xf32>
    %201 = vector.shape_cast %200 : vector<1x1x2x128xf32> to vector<2x128xf32>
    %202 = vector.shape_cast %199 : vector<2x128xf32> to vector<1x1x2x128xf32>
    tpu.vector_store %arg5[%c0_192, %c6_193, %c0_194, %c0_195], %202 {strides = array<i32>} : memref<1x8x2x128xf32, #tpu.memory_space<vmem>>, vector<1x1x2x128xf32>,
    %c7 = arith.constant 7 : index
    %203 = memref.load %arg4[%c7] : memref<8xf32, #tpu.memory_space<smem>>
    %204 = vector.broadcast %203 : f32 to vector<2x128xf32>
    %c0_196 = arith.constant 0 : index
    %c7_197 = arith.constant 7 : index
    %205 = memref.load %arg3[%c0_196, %c7_197] : memref<4x8xf32, #tpu.memory_space<smem>>
    %c0_198 = arith.constant 0 : index
    %c0_199 = arith.constant 0 : index
    %c0_200 = arith.constant 0 : index
    %c0_201 = arith.constant 0 : index
    %206 = vector.load %arg2[%c0_198, %c0_199, %c0_200, %c0_201] : memref<1x4x2x128xf32, #tpu.memory_space<vmem>>, vector<1x1x2x128xf32>
    %207 = vector.shape_cast %206 : vector<1x1x2x128xf32> to vector<2x128xf32>
    %208 = vector.broadcast %205 : f32 to vector<2x128xf32>
    %209 = arith.mulf %208, %207 : vector<2x128xf32>
    %210 = arith.addf %204, %209 : vector<2x128xf32>
    %c1_202 = arith.constant 1 : index
    %c7_203 = arith.constant 7 : index
    %211 = memref.load %arg3[%c1_202, %c7_203] : memref<4x8xf32, #tpu.memory_space<smem>>
    %c0_204 = arith.constant 0 : index
    %c1_205 = arith.constant 1 : index
    %c0_206 = arith.constant 0 : index
    %c0_207 = arith.constant 0 : index
    %212 = vector.load %arg2[%c0_204, %c1_205, %c0_206, %c0_207] : memref<1x4x2x128xf32, #tpu.memory_space<vmem>>, vector<1x1x2x128xf32>
    %213 = vector.shape_cast %212 : vector<1x1x2x128xf32> to vector<2x128xf32>
    %214 = vector.broadcast %211 : f32 to vector<2x128xf32>
    %215 = arith.mulf %214, %213 : vector<2x128xf32>
    %216 = arith.addf %210, %215 : vector<2x128xf32>
    %c2_208 = arith.constant 2 : index
    %c7_209 = arith.constant 7 : index
    %217 = memref.load %arg3[%c2_208, %c7_209] : memref<4x8xf32, #tpu.memory_space<smem>>
    %c0_210 = arith.constant 0 : index
    %c2_211 = arith.constant 2 : index
    %c0_212 = arith.constant 0 : index
    %c0_213 = arith.constant 0 : index
    %218 = vector.load %arg2[%c0_210, %c2_211, %c0_212, %c0_213] : memref<1x4x2x128xf32, #tpu.memory_space<vmem>>, vector<1x1x2x128xf32>
    %219 = vector.shape_cast %218 : vector<1x1x2x128xf32> to vector<2x128xf32>
    %220 = vector.broadcast %217 : f32 to vector<2x128xf32>
    %221 = arith.mulf %220, %219 : vector<2x128xf32>
    %222 = arith.addf %216, %221 : vector<2x128xf32>
    %c3_214 = arith.constant 3 : index
    %c7_215 = arith.constant 7 : index
    %223 = memref.load %arg3[%c3_214, %c7_215] : memref<4x8xf32, #tpu.memory_space<smem>>
    %c0_216 = arith.constant 0 : index
    %c3_217 = arith.constant 3 : index
    %c0_218 = arith.constant 0 : index
    %c0_219 = arith.constant 0 : index
    %224 = vector.load %arg2[%c0_216, %c3_217, %c0_218, %c0_219] : memref<1x4x2x128xf32, #tpu.memory_space<vmem>>, vector<1x1x2x128xf32>
    %225 = vector.shape_cast %224 : vector<1x1x2x128xf32> to vector<2x128xf32>
    %226 = vector.broadcast %223 : f32 to vector<2x128xf32>
    %227 = arith.mulf %226, %225 : vector<2x128xf32>
    %228 = arith.addf %222, %227 : vector<2x128xf32>
    %c0_220 = arith.constant 0 : index
    %c7_221 = arith.constant 7 : index
    %c0_222 = arith.constant 0 : index
    %c0_223 = arith.constant 0 : index
    %229 = vector.load %arg5[%c0_220, %c7_221, %c0_222, %c0_223] : memref<1x8x2x128xf32, #tpu.memory_space<vmem>>, vector<1x1x2x128xf32>
    %230 = vector.shape_cast %229 : vector<1x1x2x128xf32> to vector<2x128xf32>
    %231 = vector.shape_cast %228 : vector<2x128xf32> to vector<1x1x2x128xf32>
    tpu.vector_store %arg5[%c0_220, %c7_221, %c0_222, %c0_223], %231 {strides = array<i32>} : memref<1x8x2x128xf32, #tpu.memory_space<vmem>>, vector<1x1x2x128xf32>,
    return
  }
  func.func @transform_0(%arg0: i32, %arg1: i32) -> (i32, i32, i32, i32) {
    %c0_i32 = arith.constant 0 : i32
    %c0_i32_0 = arith.constant 0 : i32
    %c0_i32_1 = arith.constant 0 : i32
    return %arg0, %c0_i32, %arg1, %c0_i32_0 : i32, i32, i32, i32
  }
  func.func @transform_1(%arg0: i32, %arg1: i32) -> (i32, i32) {
    %c0_i32 = arith.constant 0 : i32
    %c0_i32_0 = arith.constant 0 : i32
    %c0_i32_1 = arith.constant 0 : i32
    return %c0_i32, %c0_i32_0 : i32, i32
  }
  func.func @transform_2(%arg0: i32, %arg1: i32) -> i32 {
    %c0_i32 = arith.constant 0 : i32
    %c0_i32_0 = arith.constant 0 : i32
    return %c0_i32 : i32
  }
  func.func @transform_3(%arg0: i32, %arg1: i32) -> (i32, i32, i32, i32) {
    %c0_i32 = arith.constant 0 : i32
    %c0_i32_0 = arith.constant 0 : i32
    %c0_i32_1 = arith.constant 0 : i32
    return %arg0, %c0_i32, %arg1, %c0_i32_0 : i32, i32, i32, i32
  }
}

</mosaic_0001>

<bundles_post_ra>
// kernel: _conv1x1_nchw_impl.1
= control target key start
LH: loop header
LB: loop body
LE: loop exit
PB: predicated region body
PF: predicated region fallthrough
CT: control target
= control target key end

     0   :  { %8 = vsyncpa [#allocation3], 0  ;;  %s967_s0 = inlined_call_operand.vmem [shape: f32[4,4,2,128], index: 0, kind: input, shape index: {}]   ;;  %s968_s1 = inlined_call_operand.vmem [shape: f32[4,8], index: 1, kind: input, shape index: {}]   ;;  %s969_s2 = inlined_call_operand.vmem [shape: f32[8], index: 2, kind: input, shape index: {}]   ;;  %s970_s3 = inlined_call_operand.vmem [shape: f32[4,8,2,128], index: 3, kind: output, shape index: {}]  }
   0x1   :  { %9 = vsyncpa [#allocation5], 0  ;;  %s744_s12 = smov 0   ;;  %s746_s13 = smov 0  }
   0x2   :  { %s748_s14 = smov 0  }
   0x3 LB: > { %s529_s15 = sadd.s32 4294967295, %s720_s14   ;;  %s27_s16 = sadd.s32 1, %s716_s13  ;;  %s720_s14 = sphi %s748_s14, %s15_s14   ;;  %s716_s13 = sphi %s746_s13, %s980_s13   ;;  %s712_s12 = sphi %s744_s12, %s979_s12  }
   0x4   : > { %p29_p0 = scmp.ge.s32.totalorder %s27_s16, 4  ;;  %p531_p1 = scmp.ge.s32.totalorder %s720_s14, 1 }
   0x5   : > { %p130_p2 = scmp.lt.s32.totalorder %s720_s14, 5  ;;  %p769_p4 = scmp.eq.s32.totalorder %s529_s15, 0 }
   0x6   : > { %s982_s16 = smov (%p29_p0, %s27_s16), 0  ;;  %s143_s21 = sshll.u32 %s968_s1, 4  ;;  %s144_s21 = int_to_ptr.vmem [resolvable:$true] %s143_s21 }
   0x7   : > { %p765_p3 = pnand %p531_p1, %p130_p2  ;;  %s154_s24 = sshll.u32 %s969_s2, 4  ;;  %s155_s24 = int_to_ptr.vmem [resolvable:$true] %s154_s24 }
   0x8   : > { %s975_s18 = scalar_select %p769_p4, 1, 0 }
   0x9   : > { %s974_s17 = scalar_select %p765_p3, 1, 0 }
   0xa   : > { %p623_p5 = pneg %p765_p3  ;;  %s660_s26 = scalar_lea.vmem %s144_s21, 64 }
   0xb   : > { %p661_p7 = scmp.ne.s32.totalorder %s144_s21, %s660_s26  ;;  %p668_p11 = scmp.lt.s32.totalorder %s144_s21, %s144_s21 }
   0xc   : > { %p783_p6 = pnand %p769_p4, %p623_p5  ;;  %p669_p12 = scmp.lt.s32.totalorder %s660_s26, %s660_s26 }
   0xe   : > { %p662_p8 = pneg %p783_p6  ;;  %p670_p13 = por %p669_p12, %p668_p11 }
  0x10   : > { %p663_p9 = pnand %p662_p8, %p661_p7 }
  0x12   : > { %p664_p10 = pneg %p663_p9 }
  0x14   : > { %p671_p0 = pnand %p670_p13, %p664_p10 }
  0x16   : > { %674 = shalt.err (!%p671_p0)
}
  0x17   : > { %s722_s27 = smov [#allocation2]   ;;  %s675_s28 = scalar_lea.vmem %s155_s24, 16 }
  0x18   : > { %626 = dma.vmem_to_smem (!%p783_p6), %s144_s21, 64, %s722_s27, [#allocation3]  }
  0x19   : > { %p676_p1 = scmp.ne.s32.totalorder %s155_s24, %s675_s28  ;;  %p683_p4 = scmp.lt.s32.totalorder %s155_s24, %s155_s24 }
  0x1a   : > { %p684_p3 = scmp.lt.s32.totalorder %s675_s28, %s675_s28 }
  0x1b   : > { %p678_p2 = pnand %p676_p1, %p662_p8 }
  0x1c   : > { %p685_p7 = por %p684_p3, %p683_p4 }
  0x1d   : > { %p679_p5 = pneg %p678_p2 }
  0x1f   : > { %p686_p9 = pnand %p685_p7, %p679_p5 }
  0x21   : > { %689 = shalt.err (!%p686_p9)
}
  0x22   : > { %s723_s29 = smov [#allocation4]   ;;  %p977_p10 = scmp.ne.s32.totalorder %s974_s17, 0 }
  0x23   : > { %629 = dma.vmem_to_smem (!%p783_p6), %s155_s24, 16, %s723_s29, [#allocation5]  }
  0x24   : > { %178 = sbr.rel (%p977_p10) target bundleno = 91 (0x5b), region = 32  ;;  %p978_p11 = scmp.ne.s32.totalorder (!%p977_p10), %s975_s18, 0 }
  0x2b   : > { %703 = dma.done.wait (%p978_p11), [#allocation3], 64  }
  0x2c   : > { %705 = vsyncadd (%p978_p11), [#allocation3], 4294967232 }
  0x2d   : > { %707 = dma.done.wait (%p978_p11), [#allocation5], 16  }
  0x2e   : > { %709 = vsyncadd (%p978_p11), [#allocation5], 4294967280 }
  0x2f   : > { %188 = sfence }
  0x30   : > { %p213_p3 = scmp.lt.s32.totalorder %s712_s12, 3  ;;  %s229_s30 = sld [smem:[#allocation4]] }
  0x31   : > { %s231_s4 = sld [smem:[#allocation2]]  ;;  %s816_s15 = sld [smem:[#allocation4 + $0x1]] }
  0x32   : > { %s542_s5 = sld [smem:[#allocation2 + $0x80]]  ;;  %s984_s12 = smov (!%p213_p3, %s712_s12), 3 }
  0x33   : > { %s544_s6 = sld [smem:[#allocation2 + $0x100]]  ;;  %s613_s8 = sshll.u32 %s984_s12, 3 }
  0x34   : > { %s546_s7 = sld [smem:[#allocation2 + $0x180]]  ;;  %s811_s11 = scalar_lea.vmem %s967_s0, %s613_s8 }
  0x35   : > { %v232_v0 = vld [vmem:[%s811_s11] sm:$0x3]  ;;  %v543_v1 = vld [vmem:[%s811_s11 + $0x2] sm:$0x3]  ;;  %v545_v5 = vld [vmem:[%s811_s11 + $0x4] sm:$0x3] }
  0x36   : > { %v230_v2 = vstv %s229_s30  ;;  %s549_s17 = sld [smem:[#allocation2 + $0x1]]  ;;  %v547_v9 = vld [vmem:[%s811_s11 + $0x6] sm:$0x3]  ;;  %s823_s21 = sld [smem:[#allocation4 + $0x2]]  ;;  %v258_v13 = vld [vmem:[%s811_s11] sm:$0x3] }
  0x37   : > { %v233_v3 = vstv %s231_s4  ;;  %s550_s18 = sld [smem:[#allocation2 + $0x81]]  ;;  %s825_s22 = sld [smem:[#allocation2 + $0x2]]  ;;  %v551_v16 = vld [vmem:[%s811_s11 + $0x2] sm:$0x3]  ;;  %v256_v17 = vstv %s816_s15  ;;  %v553_v19 = vld [vmem:[%s811_s11 + $0x4] sm:$0x3] }
  0x38   : > { %v239_v4 = vstv %s542_s5  ;;  %v234_v6 = vmul.f32 %v233_v3, %v232_v0  ;;  %s819_s19 = sld [smem:[#allocation2 + $0x101]]  ;;  %s614_s23 = sshll.u32 %s984_s12, 4  ;;  %v555_v23 = vld [vmem:[%s811_s11 + $0x6] sm:$0x3]  ;;  %v282_v24 = vld [vmem:[%s811_s11] sm:$0x3] }
  0x39   : > { %v240_v7 = vmul.f32 %v543_v1, %v239_v4  ;;  %v245_v8 = vstv %s544_s6  ;;  %s821_s20 = sld [smem:[#allocation2 + $0x181]]  ;;  %s829_s24 = sld [smem:[#allocation2 + $0x82]]  ;;  %v560_v28 = vld [vmem:[%s811_s11 + $0x2] sm:$0x3]  ;;  %v562_v32 = vld [vmem:[%s811_s11 + $0x4] sm:$0x3] }
  0x3a   : > { %v251_v10 = vstv %s546_s7  ;;  %v235_v11 = vadd.f32 %v234_v6, %v230_v2  ;;  %v246_v12 = vmul.f32 %v545_v5, %v245_v8  ;;  %s832_s25 = sld [smem:[#allocation2 + $0x102]]  ;;  %s838_s27 = sld [smem:[#allocation4 + $0x3]]  ;;  %v306_v37 = vld [vmem:[%s811_s11] sm:$0x3]  ;;  %v564_v42 = vld [vmem:[%s811_s11 + $0x6] sm:$0x3] }
  0x3b   : > { %v252_v15 = vmul.f32 %v547_v9, %v251_v10  ;;  %s834_s26 = sld [smem:[#allocation2 + $0x182]]  ;;  %s840_s12 = sld [smem:[#allocation2 + $0x3]]  ;;  %v569_v46 = vld [vmem:[%s811_s11 + $0x2] sm:$0x3]  ;;  %v571_v51 = vld [vmem:[%s811_s11 + $0x4] sm:$0x3] }
  0x3c   : > { %v241_v14 = vadd.f32 %v240_v7, %v235_v11  ;;  %v259_v18 = vstv %s549_s17  ;;  %s845_s30 = scalar_lea.vmem %s970_s3, %s614_s23  ;;  %s849_s4 = sld [smem:[#allocation2 + $0x83]]  ;;  %v280_v34 = vstv %s823_s21  ;;  %v573_v52 = vld [vmem:[%s811_s11 + $0x6] sm:$0x3]  ;;  %v330_v57 = vld [vmem:[%s811_s11] sm:$0x3] }
  0x3d   : > { %v260_v21 = vmul.f32 %v259_v18, %v258_v13  ;;  %v264_v22 = vstv %s550_s18  ;;  %s854_s5 = sld [smem:[#allocation2 + $0x103]]  ;;  %s859_s7 = sld [smem:[#allocation4 + $0x4]]  ;;  %v283_v35 = vstv %s825_s22  ;;  %v578_v62 = vld [vmem:[%s811_s11 + $0x2] sm:$0x3]  ;;  %v580_v3 = vld [vmem:[%s811_s11 + $0x4] sm:$0x3] }
  0x3e   : > { %v247_v20 = vadd.f32 %v246_v12, %v241_v14  ;;  %v265_v25 = vmul.f32 %v551_v16, %v264_v22  ;;  %v269_v26 = vstv %s819_s19  ;;  %s856_s6 = sld [smem:[#allocation2 + $0x183]]  ;;  %s861_s8 = sld [smem:[#allocation2 + $0x4]]  ;;  %v284_v39 = vmul.f32 %v283_v35, %v282_v24  ;;  %v582_v4 = vld [vmem:[%s811_s11 + $0x6] sm:$0x3]  ;;  %v354_v9 = vld [vmem:[%s811_s11] sm:$0x3] }
  0x3f   : > { %v274_v27 = vstv %s821_s20  ;;  %v261_v30 = vadd.f32 %v260_v21, %v256_v17  ;;  %v270_v31 = vmul.f32 %v553_v19, %v269_v26  ;;  %v288_v36 = vstv %s829_s24  ;;  %s867_s9 = sld [smem:[#allocation2 + $0x84]]  ;;  %s880_s17 = sld [smem:[#allocation4 + $0x5]]  ;;  %v587_v14 = vld [vmem:[%s811_s11 + $0x2] sm:$0x3]  ;;  %v589_v19 = vld [vmem:[%s811_s11 + $0x4] sm:$0x3] }
  0x40   : > { %v253_v29 = vadd.f32 %v252_v15, %v247_v20  ;;  %v275_v33 = vmul.f32 %v555_v23, %v274_v27  ;;  %s869_s10 = sld [smem:[#allocation2 + $0x104]]  ;;  %v289_v40 = vmul.f32 %v560_v28, %v288_v36  ;;  %v293_v41 = vstv %s832_s25  ;;  %s882_s18 = sld [smem:[#allocation2 + $0x5]]  ;;  %v591_v20 = vld [vmem:[%s811_s11 + $0x6] sm:$0x3]  ;;  %v598_v35 = vld [vmem:[%s811_s11 + $0x4] sm:$0x3] }
  0x41   : > { %v266_v38 = vadd.f32 %v265_v25, %v261_v30  ;;  %s874_s15 = sld [smem:[#allocation2 + $0x184]]  ;;  %v298_v43 = vstv %s834_s26  ;;  %v304_v44 = vstv %s838_s27  ;;  %v307_v45 = vstv %s840_s12  ;;  %s886_s19 = sld [smem:[#allocation2 + $0x85]]  ;;  %v378_v25 = vld [vmem:[%s811_s11] sm:$0x3] }
  0x42   : > { %254 = vst [vmem:[%s845_s30] sm:$0x3] %v253_v29  ;;  %v285_v48 = vadd.f32 %v284_v39, %v280_v34  ;;  %v294_v49 = vmul.f32 %v562_v32, %v293_v41  ;;  %v308_v50 = vmul.f32 %v307_v45, %v306_v37  ;;  %v299_v53 = vmul.f32 %v564_v42, %v298_v43  ;;  %s892_s20 = sld [smem:[#allocation2 + $0x105]]  ;;  %s897_s22 = sld [smem:[#allocation4 + $0x6]]  ;;  %v596_v30 = vld [vmem:[%s811_s11 + $0x2] sm:$0x3] }
  0x43   : > { %v271_v47 = vadd.f32 %v270_v31, %v266_v38  ;;  %v312_v54 = vstv %s849_s4  ;;  %v317_v55 = vstv %s854_s5  ;;  %s894_s21 = sld [smem:[#allocation2 + $0x185]]  ;;  %s899_s23 = sld [smem:[#allocation2 + $0x6]]  ;;  %v328_v1 = vstv %s859_s7  ;;  %v402_v41 = vld [vmem:[%s811_s11] sm:$0x3] }
  0x44   : > { %v322_v56 = vstv %s856_s6  ;;  %v290_v59 = vadd.f32 %v289_v40, %v285_v48  ;;  %v309_v60 = vadd.f32 %v308_v50, %v304_v44  ;;  %v313_v61 = vmul.f32 %v569_v46, %v312_v54  ;;  %s905_s24 = sld [smem:[#allocation2 + $0x86]]  ;;  %s918_s27 = sld [smem:[#allocation4 + $0x7]]  ;;  %v600_v40 = vld [vmem:[%s811_s11 + $0x6] sm:$0x3]  ;;  %v605_v42 = vld [vmem:[%s811_s11 + $0x2] sm:$0x3] }
  0x45   : > { %v276_v58 = vadd.f32 %v275_v33, %v271_v47  ;;  %v318_v63 = vmul.f32 %v571_v51, %v317_v55  ;;  %v323_v0 = vmul.f32 %v573_v52, %v322_v56  ;;  %v331_v2 = vstv %s861_s8  ;;  %s910_s25 = sld [smem:[#allocation2 + $0x106]]  ;;  %s920_s12 = sld [smem:[#allocation2 + $0x7]]  ;;  %v607_v55 = vld [vmem:[%s811_s11 + $0x4] sm:$0x3] }
  0x46   : > { %v295_v5 = vadd.f32 %v294_v49, %v290_v59  ;;  %v314_v6 = vadd.f32 %v313_v61, %v309_v60  ;;  %v332_v7 = vmul.f32 %v331_v2, %v330_v57  ;;  %v336_v8 = vstv %s867_s9  ;;  %s912_s26 = sld [smem:[#allocation2 + $0x186]]  ;;  %s924_s28 = sld [smem:[#allocation2 + $0x87]]  ;;  %v609_v61 = vld [vmem:[%s811_s11 + $0x6] sm:$0x3] }
  0x47   : > { %556 = vst [vmem:[%s845_s30 + $0x2] sm:$0x3] %v276_v58  ;;  %v337_v10 = vmul.f32 %v578_v62, %v336_v8  ;;  %v341_v11 = vstv %s869_s10  ;;  %v346_v12 = vstv %s874_s15  ;;  %v352_v13 = vstv %s880_s17  ;;  %s930_s29 = sld [smem:[#allocation2 + $0x107]] }
  0x48   : > { %v300_v15 = vadd.f32 %v299_v53, %v295_v5  ;;  %v319_v16 = vadd.f32 %v318_v63, %v314_v6  ;;  %v333_v17 = vadd.f32 %v332_v7, %v328_v1  ;;  %v342_v18 = vmul.f32 %v580_v3, %v341_v11  ;;  %s932_s4 = sld [smem:[#allocation2 + $0x187]] }
  0x49   : > { %v347_v21 = vmul.f32 %v582_v4, %v346_v12  ;;  %v355_v22 = vstv %s882_s18  ;;  %v360_v23 = vstv %s886_s19  ;;  %v365_v24 = vstv %s892_s20 }
  0x4a   : > { %565 = vst [vmem:[%s845_s30 + $0x4] sm:$0x3] %v300_v15  ;;  %v324_v26 = vadd.f32 %v323_v0, %v319_v16  ;;  %v338_v27 = vadd.f32 %v337_v10, %v333_v17  ;;  %v356_v28 = vmul.f32 %v355_v22, %v354_v9  ;;  %v361_v29 = vmul.f32 %v587_v14, %v360_v23 }
  0x4b   : > { %v366_v31 = vmul.f32 %v589_v19, %v365_v24  ;;  %v370_v32 = vstv %s894_s21  ;;  %v376_v33 = vstv %s897_s22  ;;  %v379_v34 = vstv %s899_s23 }
  0x4c   : > { %574 = vst [vmem:[%s845_s30 + $0x6] sm:$0x3] %v324_v26  ;;  %v343_v36 = vadd.f32 %v342_v18, %v338_v27  ;;  %v357_v37 = vadd.f32 %v356_v28, %v352_v13  ;;  %v371_v38 = vmul.f32 %v591_v20, %v370_v32  ;;  %v380_v39 = vmul.f32 %v379_v34, %v378_v25 }
  0x4d   : > { %v384_v43 = vstv %s905_s24  ;;  %v389_v44 = vstv %s910_s25  ;;  %v394_v45 = vstv %s912_s26  ;;  %v400_v46 = vstv %s918_s27 }
  0x4e   : > { %v348_v47 = vadd.f32 %v347_v21, %v343_v36  ;;  %v362_v48 = vadd.f32 %v361_v29, %v357_v37  ;;  %v381_v49 = vadd.f32 %v380_v39, %v376_v33  ;;  %v385_v50 = vmul.f32 %v596_v30, %v384_v43 }
  0x4f   : > { %v390_v51 = vmul.f32 %v598_v35, %v389_v44  ;;  %v395_v52 = vmul.f32 %v600_v40, %v394_v45  ;;  %v403_v53 = vstv %s920_s12  ;;  %v408_v54 = vstv %s924_s28 }
  0x50   : > { %583 = vst [vmem:[%s845_s30 + $0x8] sm:$0x3] %v348_v47  ;;  %v367_v56 = vadd.f32 %v366_v31, %v362_v48  ;;  %v386_v57 = vadd.f32 %v385_v50, %v381_v49  ;;  %v404_v58 = vmul.f32 %v403_v53, %v402_v41  ;;  %v409_v59 = vmul.f32 %v605_v42, %v408_v54 }
  0x51   : > { %v413_v60 = vstv %s930_s29  ;;  %v418_v62 = vstv %s932_s4 }
  0x52   : > { %v372_v63 = vadd.f32 %v371_v38, %v367_v56  ;;  %v391_v0 = vadd.f32 %v390_v51, %v386_v57  ;;  %v405_v1 = vadd.f32 %v404_v58, %v400_v46  ;;  %v414_v2 = vmul.f32 %v607_v55, %v413_v60 }
  0x53   : > { %v419_v5 = vmul.f32 %v609_v61, %v418_v62 }
  0x54   : > { %592 = vst [vmem:[%s845_s30 + $0xa] sm:$0x3] %v372_v63  ;;  %v396_v3 = vadd.f32 %v395_v52, %v391_v0  ;;  %v410_v4 = vadd.f32 %v409_v59, %v405_v1 }
  0x56   : > { %601 = vst [vmem:[%s845_s30 + $0xc] sm:$0x3] %v396_v3  ;;  %v415_v6 = vadd.f32 %v414_v2, %v410_v4 }
  0x58   : > { %v420_v7 = vadd.f32 %v419_v5, %v415_v6 }
  0x5a   : > { %610 = vst [vmem:[%s845_s30 + $0xe] sm:$0x3] %v420_v7 }
  0x5b PF: > { %s15_s14 = sadd.s32 1, %s720_s14   ;;  %s979_s12 = smov %s716_s13 }
  0x5c   : > { %p12_p4 = scmp.ge.s32.totalorder %s15_s14, 6   ;;  %s980_s13 = smov %s982_s16 }
  0x5e   :  { %14 = sbr.rel (!%p12_p4) target bundleno = 3 (0x3), region = 81 }
  0x65   :  { %450 = vsyncpa [#allocation3], 1 }
  0x66   :  { %452 = vsyncpa [#allocation3 + $0x1], 1 }
  0x67   :  { %453 = vsyncpa [#allocation5], 1 }

</bundles_post_ra>
